<compile_context>
chip_gen: v7x
topology: tpu7x:2x2x1
jax: 0.10.0
libtpu: 0.0.40
codegen_flags: <defaults>
</compile_context>

<pallas_src>
import functools

import jax
import jax.numpy as jnp
from jax.experimental import pallas as pl
from jax.experimental.pallas import tpu as pltpu


def _round_up(x: int, m: int) -> int:
    return ((x + m - 1) // m) * m


def _rbf_kernel(x_ref, ct_ref, cnorm_ref, negbeta_ref, wt_ref, b_ref, o_ref):
    # x_ref:       (TM, Dp)  tile of flattened inputs
    # ct_ref:      (Dp, Kp)  centers^T (VMEM-resident across the grid)
    # cnorm_ref:   (1, Kp)   ||c_k||^2
    # negbeta_ref: (1, Kp)   -beta_k (lane axis == center axis)
    # wt_ref:      (Kp, Cp)  linear weight^T (C padded to lane width)
    # b_ref:       (1, Cp)   linear bias
    # o_ref:       (TM, Cp)  class scores
    x = x_ref[...].astype(jnp.float32)
    # Cross term on the MXU, f32 accumulation.
    xc = jnp.dot(x, ct_ref[...].astype(jnp.float32),
                 preferred_element_type=jnp.float32)            # (TM, Kp)
    x_norm2 = jnp.sum(x * x, axis=-1, keepdims=True)            # (TM, 1)
    d2 = x_norm2 + cnorm_ref[...] - 2.0 * xc                    # (TM, Kp)
    d2 = jnp.maximum(d2, 0.0)        # clamp fp cancellation -> no NaN through sqrt
    dist = jnp.sqrt(d2)
    radial = jnp.exp(negbeta_ref[...] * dist)                   # EUP exp, stays in VMEM
    scores = jnp.dot(radial, wt_ref[...].astype(jnp.float32),
                     preferred_element_type=jnp.float32)
    scores = scores + b_ref[...]
    o_ref[...] = scores.astype(o_ref.dtype)


@functools.partial(jax.jit, static_argnames=("tile_m",))
def rbf_net_forward(batches, centers, beta, weight, bias, *, tile_m=None):
    """Fused RbfNet forward: exp(-beta * ||x - c||) @ W^T + b.

    batches: (N, ...)   any trailing shape; flattened to (N, D)
    centers: (K, ...)   flattened to (K, D)
    beta:    (1, K) or (K,)
    weight:  (C, K)     PyTorch nn.Linear layout
    bias:    (C,)
    returns: (N, C) float32 class scores
    """
    n = batches.shape[0]
    x = batches.reshape(n, -1).astype(jnp.float32)
    k = centers.shape[0]
    c_flat = centers.reshape(k, -1).astype(jnp.float32)
    d = x.shape[1]
    c = weight.shape[0]

    # Lane/sublane-friendly padded sizes.
    dp = _round_up(d, 128)
    kp = _round_up(k, 128)
    cp = _round_up(c, 128)
    if tile_m is None:
        tile_m = min(512, _round_up(n, 8))
    np_ = _round_up(n, tile_m)

    # Zero padding is exact: padded D dims add 0 to every distance; padded centers
    # get -beta = 0 (radial = 1) and zero W rows (no score contribution); padded C
    # columns are sliced off below.
    x_p = jnp.zeros((np_, dp), jnp.float32).at[:n, :d].set(x)
    ct_p = jnp.zeros((dp, kp), jnp.float32).at[:d, :k].set(c_flat.T)
    cnorm_p = jnp.zeros((1, kp), jnp.float32).at[:, :k].set(
        jnp.sum(c_flat * c_flat, axis=1))
    negbeta_p = jnp.zeros((1, kp), jnp.float32).at[:, :k].set(
        -beta.reshape(-1).astype(jnp.float32))
    wt_p = jnp.zeros((kp, cp), jnp.float32).at[:k, :c].set(
        weight.astype(jnp.float32).T)
    b_p = jnp.zeros((1, cp), jnp.float32).at[:, :c].set(
        bias.reshape(1, -1).astype(jnp.float32))

    cost = pl.CostEstimate(
        flops=2 * np_ * dp * kp + 2 * np_ * kp * cp,
        transcendentals=2 * np_ * kp,
        bytes_accessed=4 * (np_ * dp + dp * kp + kp * cp + np_ * cp + 3 * kp + cp),
    )

    out = pl.pallas_call(
        _rbf_kernel,
        out_shape=jax.ShapeDtypeStruct((np_, cp), jnp.float32),
        grid_spec=pltpu.PrefetchScalarGridSpec(
            num_scalar_prefetch=0,
            grid=(np_ // tile_m,),
            in_specs=[
                pl.BlockSpec((tile_m, dp), lambda i: (i, 0)),   # x: tiled over N
                pl.BlockSpec((dp, kp), lambda i: (0, 0)),       # centers^T: resident
                pl.BlockSpec((1, kp), lambda i: (0, 0)),        # ||c||^2: resident
                pl.BlockSpec((1, kp), lambda i: (0, 0)),        # -beta: resident
                pl.BlockSpec((kp, cp), lambda i: (0, 0)),       # W^T: resident
                pl.BlockSpec((1, cp), lambda i: (0, 0)),        # bias: resident
            ],
            out_specs=pl.BlockSpec((tile_m, cp), lambda i: (i, 0)),
        ),
        compiler_params=pltpu.CompilerParams(
            dimension_semantics=("parallel",),
        ),
        cost_estimate=cost,
    )(x_p, ct_p, cnorm_p, negbeta_p, wt_p, b_p)

    return out[:n, :c]


def _rbf_reference(batches, centers, beta, weight, bias):
    """Pure-JAX reference matching the PyTorch forward."""
    n = batches.shape[0]
    x = batches.reshape(n, -1).astype(jnp.float32)
    cf = centers.reshape(centers.shape[0], -1).astype(jnp.float32)
    diff = x[:, None, :] - cf[None, :, :]
    dist = jnp.sqrt(jnp.sum(diff * diff, axis=-1))
    radial = jnp.exp(-beta.reshape(1, -1).astype(jnp.float32) * dist)
    return radial @ weight.astype(jnp.float32).T + bias.reshape(1, -1).astype(jnp.float32)


if __name__ == "__main__":
    key = jax.random.PRNGKey(0)
    k_x, k_c, k_w = jax.random.split(key, 3)

    # Small shapes consistent with the module: image batch flattened to (N, D).
    batch, chans, h, w = 2, 4, 16, 16           # -> N=2, D=1024
    num_centers, num_class = 32, 10

    x = jax.random.normal(k_x, (batch, chans, h, w), jnp.float32)
    centers = jax.random.normal(k_c, (num_centers, chans * h * w), jnp.float32)
    beta = jnp.full((1, num_centers), 0.1, jnp.float32)       # torch.ones(1, K) / 10
    weight = 0.02 * jax.random.normal(k_w, (num_class, num_centers), jnp.float32)
    bias = jnp.zeros((num_class,), jnp.float32)               # nn.Linear bias zero-init

    out = rbf_net_forward(x, centers, beta, weight, bias)
    out = jax.block_until_ready(out)

    ref = _rbf_reference(x, centers, beta, weight, bias)
    if not jnp.allclose(out, ref, rtol=5e-2, atol=1e-3):
        max_err = float(jnp.max(jnp.abs(out - ref)))
        raise AssertionError(f"kernel mismatch vs reference, max abs err={max_err}")

    print("KERNEL_OK")
</pallas_src>

<mosaic_0001>
module attributes {stable_mosaic.version = 11 : i64} {
  func.func @_rbf_kernel(%arg0: i32, %arg1: memref<8x1024xf32, #tpu.memory_space<vmem>>, %arg2: memref<1024x128xf32, #tpu.memory_space<vmem>>, %arg3: memref<1x128xf32, #tpu.memory_space<vmem>>, %arg4: memref<1x128xf32, #tpu.memory_space<vmem>>, %arg5: memref<128x128xf32, #tpu.memory_space<vmem>>, %arg6: memref<1x128xf32, #tpu.memory_space<vmem>>, %arg7: memref<8x128xf32, #tpu.memory_space<vmem>>) attributes {dimension_semantics = [#tpu.dimension_semantics<parallel>], iteration_bounds = array<i64: 1>, scalar_prefetch = 0 : i64, scratch_operands = 0 : i64, tpu.core_type = #tpu.core_type<tc>, window_params = [{transform_indices = @transform_0, window_bounds = array<i64: 8, 1024>}, {pipeline_mode = #tpu.pipeline_mode<synchronous>, transform_indices = @transform_1, window_bounds = array<i64: 1024, 128>}, {pipeline_mode = #tpu.pipeline_mode<synchronous>, transform_indices = @transform_2, window_bounds = array<i64: 1, 128>}, {pipeline_mode = #tpu.pipeline_mode<synchronous>, transform_indices = @transform_3, window_bounds = array<i64: 1, 128>}, {pipeline_mode = #tpu.pipeline_mode<synchronous>, transform_indices = @transform_4, window_bounds = array<i64: 128, 128>}, {pipeline_mode = #tpu.pipeline_mode<synchronous>, transform_indices = @transform_5, window_bounds = array<i64: 1, 128>}, {transform_indices = @transform_6, window_bounds = array<i64: 8, 128>}]} {
    %c0 = arith.constant 0 : index
    %c0_0 = arith.constant 0 : index
    %0 = vector.load %arg1[%c0, %c0_0] : memref<8x1024xf32, #tpu.memory_space<vmem>>, vector<8x1024xf32>
    %c0_1 = arith.constant 0 : index
    %c0_2 = arith.constant 0 : index
    %1 = vector.load %arg2[%c0_1, %c0_2] : memref<1024x128xf32, #tpu.memory_space<vmem>>, vector<1024x128xf32>
    %cst = arith.constant dense<0.000000e+00> : vector<8x128xf32>
    %2 = tpu.matmul %0, %1, %cst {dimension_numbers = #tpu.dot_dimension_numbers<[1], [0], [0], [1], [0, 0, 1, 1], [], []>} : vector<8x1024xf32>, vector<1024x128xf32>, vector<8x128xf32> -> vector<8x128xf32>
    %3 = arith.mulf %0, %0 : vector<8x1024xf32>
    %cst_3 = arith.constant dense<0.000000e+00> : vector<8xf32>
    %4 = vector.multi_reduction <add>, %3, %cst_3 [1] : vector<8x1024xf32> to vector<8xf32>
    %5 = vector.shape_cast %4 : vector<8xf32> to vector<8x1xf32>
    %c0_4 = arith.constant 0 : index
    %c0_5 = arith.constant 0 : index
    %6 = vector.load %arg3[%c0_4, %c0_5] : memref<1x128xf32, #tpu.memory_space<vmem>>, vector<1x128xf32>
    %7 = vector.broadcast %5 : vector<8x1xf32> to vector<8x128xf32>
    %8 = vector.broadcast %6 : vector<1x128xf32> to vector<8x128xf32>
    %9 = arith.addf %7, %8 : vector<8x128xf32>
    %cst_6 = arith.constant 2.000000e+00 : f32
    %10 = vector.broadcast %cst_6 : f32 to vector<8x128xf32>
    %11 = arith.mulf %10, %2 : vector<8x128xf32>
    %12 = arith.subf %9, %11 : vector<8x128xf32>
    %cst_7 = arith.constant 0.000000e+00 : f32
    %13 = vector.broadcast %cst_7 : f32 to vector<8x128xf32>
    %14 = arith.maximumf %12, %13 : vector<8x128xf32>
    %15 = math.sqrt %14 : vector<8x128xf32>
    %c0_8 = arith.constant 0 : index
    %c0_9 = arith.constant 0 : index
    %16 = vector.load %arg4[%c0_8, %c0_9] : memref<1x128xf32, #tpu.memory_space<vmem>>, vector<1x128xf32>
    %17 = vector.broadcast %16 : vector<1x128xf32> to vector<8x128xf32>
    %18 = arith.mulf %17, %15 : vector<8x128xf32>
    %19 = math.exp %18 : vector<8x128xf32>
    %c0_10 = arith.constant 0 : index
    %c0_11 = arith.constant 0 : index
    %20 = vector.load %arg5[%c0_10, %c0_11] : memref<128x128xf32, #tpu.memory_space<vmem>>, vector<128x128xf32>
    %cst_12 = arith.constant dense<0.000000e+00> : vector<8x128xf32>
    %21 = tpu.matmul %19, %20, %cst_12 {dimension_numbers = #tpu.dot_dimension_numbers<[1], [0], [0], [1], [0, 0, 1, 1], [], []>} : vector<8x128xf32>, vector<128x128xf32>, vector<8x128xf32> -> vector<8x128xf32>
    %c0_13 = arith.constant 0 : index
    %c0_14 = arith.constant 0 : index
    %22 = vector.load %arg6[%c0_13, %c0_14] : memref<1x128xf32, #tpu.memory_space<vmem>>, vector<1x128xf32>
    %23 = vector.broadcast %22 : vector<1x128xf32> to vector<8x128xf32>
    %24 = arith.addf %21, %23 : vector<8x128xf32>
    %c0_15 = arith.constant 0 : index
    %c0_16 = arith.constant 0 : index
    %25 = vector.load %arg7[%c0_15, %c0_16] : memref<8x128xf32, #tpu.memory_space<vmem>>, vector<8x128xf32>
    tpu.vector_store %arg7[%c0_15, %c0_16], %24 {strides = array<i32>} : memref<8x128xf32, #tpu.memory_space<vmem>>, vector<8x128xf32>,
    return
  }
  func.func @transform_0(%arg0: i32) -> (i32, i32) {
    %c0_i32 = arith.constant 0 : i32
    %c0_i32_0 = arith.constant 0 : i32
    return %arg0, %c0_i32 : i32, i32
  }
  func.func @transform_1(%arg0: i32) -> (i32, i32) {
    %c0_i32 = arith.constant 0 : i32
    %c0_i32_0 = arith.constant 0 : i32
    %c0_i32_1 = arith.constant 0 : i32
    return %c0_i32, %c0_i32_0 : i32, i32
  }
  func.func @transform_2(%arg0: i32) -> (i32, i32) {
    %c0_i32 = arith.constant 0 : i32
    %c0_i32_0 = arith.constant 0 : i32
    %c0_i32_1 = arith.constant 0 : i32
    return %c0_i32, %c0_i32_0 : i32, i32
  }
  func.func @transform_3(%arg0: i32) -> (i32, i32) {
    %c0_i32 = arith.constant 0 : i32
    %c0_i32_0 = arith.constant 0 : i32
    %c0_i32_1 = arith.constant 0 : i32
    return %c0_i32, %c0_i32_0 : i32, i32
  }
  func.func @transform_4(%arg0: i32) -> (i32, i32) {
    %c0_i32 = arith.constant 0 : i32
    %c0_i32_0 = arith.constant 0 : i32
    %c0_i32_1 = arith.constant 0 : i32
    return %c0_i32, %c0_i32_0 : i32, i32
  }
  func.func @transform_5(%arg0: i32) -> (i32, i32) {
    %c0_i32 = arith.constant 0 : i32
    %c0_i32_0 = arith.constant 0 : i32
    %c0_i32_1 = arith.constant 0 : i32
    return %c0_i32, %c0_i32_0 : i32, i32
  }
  func.func @transform_6(%arg0: i32) -> (i32, i32) {
    %c0_i32 = arith.constant 0 : i32
    %c0_i32_0 = arith.constant 0 : i32
    return %arg0, %c0_i32 : i32, i32
  }
}

</mosaic_0001>

<bundles_post_ra>
// kernel: rbf_net_forward.1
= control target key start
LH: loop header
LB: loop body
LE: loop exit
PB: predicated region body
PF: predicated region fallthrough
CT: control target
= control target key end

     0   :  { %vm937_vm0 = vmmov 0   ;;  %s1457_s1 = inlined_call_operand.vmem [shape: f32[1024,128], index: 1, kind: input, shape index: {}]   ;;  %s1458_s0 = inlined_call_operand.vmem [shape: f32[8,1024], index: 0, kind: input, shape index: {}]   ;;  %s1459_s4 = inlined_call_operand.vmem [shape: f32[128,128], index: 4, kind: input, shape index: {}]   ;;  %s1460_s2 = inlined_call_operand.vmem [shape: f32[1,128], index: 2, kind: input, shape index: {}]   ;;  %s1461_s3 = inlined_call_operand.vmem [shape: f32[1,128], index: 3, kind: input, shape index: {}]   ;;  %s1462_s5 = inlined_call_operand.vmem [shape: f32[1,128], index: 5, kind: input, shape index: {}]   ;;  %s1463_s6 = inlined_call_operand.vmem [shape: f32[8,128], index: 6, kind: output, shape index: {}]  }
   0x1   :  { %v47_v0 = vld [vmem:[%s1457_s1 + $0x80] sm:$0xff]  ;;  %v48_v1 = vld [vmem:[%s1457_s1 + $0x88] sm:$0xff]  ;;  %v49_v11 = vld [vmem:[%s1457_s1 + $0x90] sm:$0xff] }
   0x2   :  { %v79_v2 = vld [vmem:[%s1457_s1 + $0x180] sm:$0xff]  ;;  %v777_v3 = vpack.c.bf16 %v48_v1, %v47_v0  ;;  %v80_v4 = vld [vmem:[%s1457_s1 + $0x188] sm:$0xff]  ;;  %v50_v13 = vld [vmem:[%s1457_s1 + $0x98] sm:$0xff] }
   0x3   :  { %v31_v5 = vld [vmem:[%s1457_s1] sm:$0xff]  ;;  %v32_v6 = vld [vmem:[%s1457_s1 + $0x8] sm:$0xff]  ;;  %v809_v7 = vpack.c.bf16 %v80_v4, %v79_v2  ;;  %v81_v14 = vld [vmem:[%s1457_s1 + $0x190] sm:$0xff]  ;;  %v781_v16 = vpack.c.bf16 %v50_v13, %v49_v11 }
   0x4   :  { %v779_v8 = vpack.c.bf16 %v32_v6, %v31_v5  ;;  %v63_v9 = vld [vmem:[%s1457_s1 + $0x100] sm:$0xff]  ;;  %v64_v10 = vld [vmem:[%s1457_s1 + $0x108] sm:$0xff]  ;;  %778 = vmatprep.subr.bf16.mxu0 %v777_v3  ;;  %v82_v15 = vld [vmem:[%s1457_s1 + $0x198] sm:$0xff] }
   0x5   :  { %v811_v12 = vpack.c.bf16 %v64_v10, %v63_v9  ;;  %810 = vmatprep.subr.bf16.mxu1 %v809_v7  ;;  %v813_v17 = vpack.c.bf16 %v82_v15, %v81_v14  ;;  %v33_v18 = vld [vmem:[%s1457_s1 + $0x10] sm:$0xff]  ;;  %v34_v19 = vld [vmem:[%s1457_s1 + $0x18] sm:$0xff]  ;;  %v51_v23 = vld [vmem:[%s1457_s1 + $0xa0] sm:$0xff] }
   0x6   :  { %780 = vmatpush3.bf16.msra.mxu0 %v779_v8  ;;  %v65_v20 = vld [vmem:[%s1457_s1 + $0x110] sm:$0xff]  ;;  %v783_v21 = vpack.c.bf16 %v34_v19, %v33_v18  ;;  %v66_v22 = vld [vmem:[%s1457_s1 + $0x118] sm:$0xff]  ;;  %v52_v24 = vld [vmem:[%s1457_s1 + $0xa8] sm:$0xff] }
   0x7   :  { %812 = vmatpush3.bf16.msra.mxu1 %v811_v12  ;;  %782 = vmatprep.subr.bf16.mxu0 %v781_v16  ;;  %v815_v25 = vpack.c.bf16 %v66_v22, %v65_v20  ;;  %v785_v26 = vpack.c.bf16 %v52_v24, %v51_v23  ;;  %v83_v27 = vld [vmem:[%s1457_s1 + $0x1a0] sm:$0xff]  ;;  %v84_v28 = vld [vmem:[%s1457_s1 + $0x1a8] sm:$0xff]  ;;  %v53_v35 = vld [vmem:[%s1457_s1 + $0xb0] sm:$0xff] }
   0x8   :  { %814 = vmatprep.subr.bf16.mxu1 %v813_v17  ;;  %v35_v29 = vld [vmem:[%s1457_s1 + $0x20] sm:$0xff]  ;;  %v817_v30 = vpack.c.bf16 %v84_v28, %v83_v27  ;;  %v36_v31 = vld [vmem:[%s1457_s1 + $0x28] sm:$0xff]  ;;  %v54_v36 = vld [vmem:[%s1457_s1 + $0xb8] sm:$0xff] }
   0x9   :  { %v67_v32 = vld [vmem:[%s1457_s1 + $0x120] sm:$0xff]  ;;  %v68_v33 = vld [vmem:[%s1457_s1 + $0x128] sm:$0xff]  ;;  %v787_v34 = vpack.c.bf16 %v36_v31, %v35_v29  ;;  %v85_v37 = vld [vmem:[%s1457_s1 + $0x1b0] sm:$0xff]  ;;  %v789_v39 = vpack.c.bf16 %v54_v36, %v53_v35 }
   0xa   :  { %784 = vmatpush3.bf16.msra.mxu0 %v783_v21  ;;  %v819_v38 = vpack.c.bf16 %v68_v33, %v67_v32  ;;  %v86_v40 = vld [vmem:[%s1457_s1 + $0x1b8] sm:$0xff]  ;;  %v37_v41 = vld [vmem:[%s1457_s1 + $0x30] sm:$0xff]  ;;  %v55_v46 = vld [vmem:[%s1457_s1 + $0xc0] sm:$0xff] }
   0xb   :  { %816 = vmatpush3.bf16.msra.mxu1 %v815_v25  ;;  %786 = vmatprep.subr.bf16.mxu0 %v785_v26  ;;  %v38_v42 = vld [vmem:[%s1457_s1 + $0x38] sm:$0xff]  ;;  %v821_v43 = vpack.c.bf16 %v86_v40, %v85_v37  ;;  %v69_v44 = vld [vmem:[%s1457_s1 + $0x130] sm:$0xff]  ;;  %v56_v47 = vld [vmem:[%s1457_s1 + $0xc8] sm:$0xff] }
   0xc   :  { %818 = vmatprep.subr.bf16.mxu1 %v817_v30  ;;  %v70_v45 = vld [vmem:[%s1457_s1 + $0x138] sm:$0xff]  ;;  %v87_v48 = vld [vmem:[%s1457_s1 + $0x1c0] sm:$0xff]  ;;  %v88_v49 = vld [vmem:[%s1457_s1 + $0x1c8] sm:$0xff]  ;;  %v791_v50 = vpack.c.bf16 %v38_v42, %v37_v41  ;;  %v793_v52 = vpack.c.bf16 %v56_v47, %v55_v46 }
   0xd   :  { %v823_v51 = vpack.c.bf16 %v70_v45, %v69_v44  ;;  %v39_v53 = vld [vmem:[%s1457_s1 + $0x40] sm:$0xff]  ;;  %v40_v54 = vld [vmem:[%s1457_s1 + $0x48] sm:$0xff]  ;;  %v825_v56 = vpack.c.bf16 %v88_v49, %v87_v48  ;;  %v57_v58 = vld [vmem:[%s1457_s1 + $0xd0] sm:$0xff] }
   0xe   :  { %788 = vmatpush3.bf16.msra.mxu0 %v787_v34  ;;  %v71_v55 = vld [vmem:[%s1457_s1 + $0x140] sm:$0xff]  ;;  %v72_v57 = vld [vmem:[%s1457_s1 + $0x148] sm:$0xff]  ;;  %v58_v59 = vld [vmem:[%s1457_s1 + $0xd8] sm:$0xff]  ;;  %v795_v62 = vpack.c.bf16 %v40_v54, %v39_v53 }
   0xf   :  { %820 = vmatpush3.bf16.msra.mxu1 %v819_v38  ;;  %790 = vmatprep.subr.bf16.mxu0 %v789_v39  ;;  %v89_v60 = vld [vmem:[%s1457_s1 + $0x1d0] sm:$0xff]  ;;  %v90_v61 = vld [vmem:[%s1457_s1 + $0x1d8] sm:$0xff]  ;;  %v827_v63 = vpack.c.bf16 %v72_v57, %v71_v55  ;;  %v797_v0 = vpack.c.bf16 %v58_v59, %v57_v58  ;;  %v59_v6 = vld [vmem:[%s1457_s1 + $0xe0] sm:$0xff] }
  0x10   :  { %822 = vmatprep.subr.bf16.mxu1 %v821_v43  ;;  %v41_v1 = vld [vmem:[%s1457_s1 + $0x50] sm:$0xff]  ;;  %v42_v2 = vld [vmem:[%s1457_s1 + $0x58] sm:$0xff]  ;;  %v829_v4 = vpack.c.bf16 %v90_v61, %v89_v60  ;;  %v60_v7 = vld [vmem:[%s1457_s1 + $0xe8] sm:$0xff] }
  0x11   :  { %v73_v3 = vld [vmem:[%s1457_s1 + $0x150] sm:$0xff]  ;;  %v74_v5 = vld [vmem:[%s1457_s1 + $0x158] sm:$0xff]  ;;  %v91_v8 = vld [vmem:[%s1457_s1 + $0x1e0] sm:$0xff]  ;;  %v799_v10 = vpack.c.bf16 %v42_v2, %v41_v1  ;;  %v801_v14 = vpack.c.bf16 %v60_v7, %v59_v6 }
  0x12   :  { %792 = vmatpush3.bf16.msra.mxu0 %v791_v50  ;;  %v92_v9 = vld [vmem:[%s1457_s1 + $0x1e8] sm:$0xff]  ;;  %v43_v11 = vld [vmem:[%s1457_s1 + $0x60] sm:$0xff]  ;;  %v831_v13 = vpack.c.bf16 %v74_v5, %v73_v3  ;;  %v1145_v17 = vld [vmem:[%s1458_s0 + $0x18] sm:$0xff] }
  0x13   :  { %824 = vmatpush3.bf16.msra.mxu1 %v823_v51  ;;  %794 = vmatprep.subr.bf16.mxu0 %v793_v52  ;;  %v44_v12 = vld [vmem:[%s1457_s1 + $0x68] sm:$0xff]  ;;  %v75_v15 = vld [vmem:[%s1457_s1 + $0x160] sm:$0xff]  ;;  %v833_v18 = vpack.c.bf16 %v92_v9, %v91_v8  ;;  %v61_v20 = vld [vmem:[%s1457_s1 + $0xf0] sm:$0xff] }
  0x14   :  { %826 = vmatprep.subr.bf16.mxu1 %v825_v56  ;;  %v24_v16 = vld [vmem:[%s1458_s0 + $0x8] sm:$0xff]  ;;  %v62_v21 = vld [vmem:[%s1457_s1 + $0xf8] sm:$0xff]  ;;  %v93_v22 = vld [vmem:[%s1457_s1 + $0x1f0] sm:$0xff]  ;;  %293 = vmatprep.mubr.f32.mxu1 %v1145_v17  ;;  %v803_v24 = vpack.c.bf16 %v44_v12, %v43_v11  ;;  %v442_v12 = vmul.f32 %v1145_v17, %v1145_v17 }
  0x15   :  { %v76_v19 = vld [vmem:[%s1457_s1 + $0x168] sm:$0xff]  ;;  %223 = vmatprep.mubr.f32.mxu0 %v24_v16  ;;  %v94_v23 = vld [vmem:[%s1457_s1 + $0x1f8] sm:$0xff]  ;;  %v805_v26 = vpack.c.bf16 %v62_v21, %v61_v20  ;;  %v45_v27 = vld [vmem:[%s1457_s1 + $0x70] sm:$0xff]  ;;  %v440_v47 = vmul.f32 %v24_v16, %v24_v16 }
  0x16   :  { %796 = vmatpush3.bf16.msra.mxu0 %v795_v62  ;;  %v835_v25 = vpack.c.bf16 %v76_v19, %v75_v15  ;;  %v46_v28 = vld [vmem:[%s1457_s1 + $0x78] sm:$0xff]  ;;  %v77_v29 = vld [vmem:[%s1457_s1 + $0x170] sm:$0xff]  ;;  %v837_v30 = vpack.c.bf16 %v94_v23, %v93_v22  ;;  %v111_v32 = vld [vmem:[%s1457_s1 + $0x280] sm:$0xff] }
  0x17   :  { %828 = vmatpush3.bf16.msra.mxu1 %v827_v63  ;;  %798 = vmatprep.subr.bf16.mxu0 %v797_v0  ;;  %v78_v31 = vld [vmem:[%s1457_s1 + $0x178] sm:$0xff]  ;;  %v112_v33 = vld [vmem:[%s1457_s1 + $0x288] sm:$0xff]  ;;  %v143_v34 = vld [vmem:[%s1457_s1 + $0x380] sm:$0xff]  ;;  %v807_v36 = vpack.c.bf16 %v46_v28, %v45_v27 }
  0x18   :  { %830 = vmatprep.subr.bf16.mxu1 %v829_v4  ;;  %v144_v35 = vld [vmem:[%s1457_s1 + $0x388] sm:$0xff]  ;;  %v23_v37 = vld [vmem:[%s1458_s0] sm:$0xff]  ;;  %v839_v38 = vpack.c.bf16 %v78_v31, %v77_v29  ;;  %v841_v39 = vpack.c.bf16 %v112_v33, %v111_v32  ;;  %v113_v45 = vld [vmem:[%s1457_s1 + $0x290] sm:$0xff] }
  0x19   :  { %v95_v40 = vld [vmem:[%s1457_s1 + $0x200] sm:$0xff]  ;;  %v96_v41 = vld [vmem:[%s1457_s1 + $0x208] sm:$0xff]  ;;  %v873_v43 = vpack.c.bf16 %v144_v35, %v143_v34  ;;  %v114_v46 = vld [vmem:[%s1457_s1 + $0x298] sm:$0xff]  ;;  %v439_v48 = vmul.f32 %v23_v37, %v23_v37 }
  0x1a   :  { %800 = vmatpush3.bf16.msra.mxu0 %v799_v10  ;;  %v127_v42 = vld [vmem:[%s1457_s1 + $0x300] sm:$0xff]  ;;  %v128_v44 = vld [vmem:[%s1457_s1 + $0x308] sm:$0xff]  ;;  %v145_v49 = vld [vmem:[%s1457_s1 + $0x390] sm:$0xff]  ;;  %v843_v52 = vpack.c.bf16 %v96_v41, %v95_v40  ;;  %v845_v54 = vpack.c.bf16 %v114_v46, %v113_v45 }
  0x1b   :  { %832 = vmatpush3.bf16.msra.mxu1 %v831_v13  ;;  %802 = vmatprep.subr.bf16.mxu0 %v801_v14  ;;  %v146_v50 = vld [vmem:[%s1457_s1 + $0x398] sm:$0xff]  ;;  %v25_v51 = vld [vmem:[%s1458_s0 + $0x10] sm:$0xff]  ;;  %v875_v53 = vpack.c.bf16 %v128_v44, %v127_v42  ;;  %v115_v60 = vld [vmem:[%s1457_s1 + $0x2a0] sm:$0xff]  ;;  %v447_v62 = vadd.f32 %v440_v47, %v439_v48 }
  0x1c   :  { %834 = vmatprep.subr.bf16.mxu1 %v833_v18  ;;  %v97_v55 = vld [vmem:[%s1457_s1 + $0x210] sm:$0xff]  ;;  %v98_v56 = vld [vmem:[%s1457_s1 + $0x218] sm:$0xff]  ;;  %v877_v58 = vpack.c.bf16 %v146_v50, %v145_v49  ;;  %v116_v61 = vld [vmem:[%s1457_s1 + $0x2a8] sm:$0xff]  ;;  %v441_v63 = vmul.f32 %v25_v51, %v25_v51 }
  0x1d   :  { %v129_v57 = vld [vmem:[%s1457_s1 + $0x310] sm:$0xff]  ;;  %v130_v59 = vld [vmem:[%s1457_s1 + $0x318] sm:$0xff]  ;;  %v147_v0 = vld [vmem:[%s1457_s1 + $0x3a0] sm:$0xff]  ;;  %v847_v2 = vpack.c.bf16 %v98_v56, %v97_v55  ;;  %v849_v4 = vpack.c.bf16 %v116_v61, %v115_v60 }
  0x1e   :  { %804 = vmatpush3.bf16.msra.mxu0 %v803_v24  ;;  %v148_v1 = vld [vmem:[%s1457_s1 + $0x3a8] sm:$0xff]  ;;  %v879_v3 = vpack.c.bf16 %v130_v59, %v129_v57  ;;  %v99_v5 = vld [vmem:[%s1457_s1 + $0x220] sm:$0xff]  ;;  %v117_v10 = vld [vmem:[%s1457_s1 + $0x2b0] sm:$0xff]  ;;  %v448_v13 = vadd.f32 %v447_v62, %v441_v63 }
  0x1f   :  { %836 = vmatpush3.bf16.msra.mxu1 %v835_v25  ;;  %806 = vmatprep.subr.bf16.mxu0 %v805_v26  ;;  %v100_v6 = vld [vmem:[%s1457_s1 + $0x228] sm:$0xff]  ;;  %v131_v7 = vld [vmem:[%s1457_s1 + $0x320] sm:$0xff]  ;;  %v881_v8 = vpack.c.bf16 %v148_v1, %v147_v0  ;;  %v118_v11 = vld [vmem:[%s1457_s1 + $0x2b8] sm:$0xff] }
  0x20   :  { %838 = vmatprep.subr.bf16.mxu1 %v837_v30  ;;  %v132_v9 = vld [vmem:[%s1457_s1 + $0x328] sm:$0xff]  ;;  %v149_v14 = vld [vmem:[%s1457_s1 + $0x3b0] sm:$0xff]  ;;  %v150_v15 = vld [vmem:[%s1457_s1 + $0x3b8] sm:$0xff]  ;;  %v851_v16 = vpack.c.bf16 %v100_v6, %v99_v5  ;;  %v853_v20 = vpack.c.bf16 %v118_v11, %v117_v10  ;;  %v449_v26 = vadd.f32 %v448_v13, %v442_v12 }
  0x21   :  { %v101_v18 = vld [vmem:[%s1457_s1 + $0x230] sm:$0xff]  ;;  %v883_v19 = vpack.c.bf16 %v132_v9, %v131_v7  ;;  %v102_v17 = vld [vmem:[%s1457_s1 + $0x238] sm:$0xff]  ;;  %v885_v23 = vpack.c.bf16 %v150_v15, %v149_v14  ;;  %v119_v24 = vld [vmem:[%s1457_s1 + $0x2c0] sm:$0xff] }
  0x22   :  { %808 = vmatpush3.bf16.msra.mxu0 %v807_v36  ;;  %v133_v21 = vld [vmem:[%s1457_s1 + $0x330] sm:$0xff]  ;;  %v134_v22 = vld [vmem:[%s1457_s1 + $0x338] sm:$0xff]  ;;  %v120_v25 = vld [vmem:[%s1457_s1 + $0x2c8] sm:$0xff]  ;;  %v855_v30 = vpack.c.bf16 %v102_v17, %v101_v18 }
  0x23   :  { %840 = vmatpush3.bf16.msra.mxu1 %v839_v38  ;;  %842 = vmatprep.subr.bf16.mxu0 %v841_v39  ;;  %v103_v27 = vld [vmem:[%s1457_s1 + $0x240] sm:$0xff]  ;;  %v152_v29 = vld [vmem:[%s1457_s1 + $0x3c8] sm:$0xff]  ;;  %v887_v31 = vpack.c.bf16 %v134_v22, %v133_v21  ;;  %v30_v34 = vld [vmem:[%s1458_s0 + $0x38] sm:$0xff]  ;;  %v857_v35 = vpack.c.bf16 %v120_v25, %v119_v24 }
  0x24   :  { %874 = vmatprep.subr.bf16.mxu1 %v873_v43  ;;  %v151_v28 = vld [vmem:[%s1457_s1 + $0x3c0] sm:$0xff]  ;;  %v28_v32 = vld [vmem:[%s1458_s0 + $0x28] sm:$0xff]  ;;  %v121_v42 = vld [vmem:[%s1457_s1 + $0x2d0] sm:$0xff]  ;;  %v446_v55 = vmul.f32 %v30_v34, %v30_v34 }
  0x25   :  { %224 = vmatmul.mubr.f32.vlgmr.msra.gmra.mrb[0].mxu0 %v23_v37  ;;  %v1300_v33 = vld [vmem:[%s1458_s0 + $0x20] sm:$0xff]  ;;  %v104_v36 = vld [vmem:[%s1457_s1 + $0x248] sm:$0xff]  ;;  %v444_v39 = vmul.f32 %v28_v32, %v28_v32  ;;  %v889_v41 = vpack.c.bf16 %v152_v29, %v151_v28  ;;  %v122_v43 = vld [vmem:[%s1457_s1 + $0x2d8] sm:$0xff] }
  0x26   :  { %294 = vmatmul.mubr.f32.vlgmr.msra.gmra.mrb[0].mxu1 %v25_v51  ;;  %844 = vmatpush3.bf16.msra.mxu0 %v843_v52  ;;  %v135_v37 = vld [vmem:[%s1457_s1 + $0x340] sm:$0xff]  ;;  %v136_v38 = vld [vmem:[%s1457_s1 + $0x348] sm:$0xff]  ;;  %v443_v40 = vmul.f32 %v1300_v33, %v1300_v33  ;;  %v1325_v44 = vld [vmem:[%s1458_s0 + $0x30] sm:$0xff]  ;;  %v859_v49 = vpack.c.bf16 %v104_v36, %v103_v27  ;;  %v861_v51 = vpack.c.bf16 %v122_v43, %v121_v42 }
  0x27   :  { %876 = vmatpush3.bf16.msra.mxu1 %v875_v53  ;;  %846 = vmatprep.subr.bf16.mxu0 %v845_v54  ;;  %v153_v45 = vld [vmem:[%s1457_s1 + $0x3d0] sm:$0xff]  ;;  %v154_v46 = vld [vmem:[%s1457_s1 + $0x3d8] sm:$0xff]  ;;  %v445_v47 = vmul.f32 %v1325_v44, %v1325_v44  ;;  %v891_v50 = vpack.c.bf16 %v136_v38, %v135_v37  ;;  %v123_v59 = vld [vmem:[%s1457_s1 + $0x2e0] sm:$0xff] }
  0x28   :  { %878 = vmatprep.subr.bf16.mxu1 %v877_v58  ;;  %363 = vmatprep.mubr.f32.mxu0 %v28_v32  ;;  %v450_v48 = vadd.f32 %v449_v26, %v443_v40  ;;  %v105_v52 = vld [vmem:[%s1457_s1 + $0x250] sm:$0xff]  ;;  %v106_v53 = vld [vmem:[%s1457_s1 + $0x258] sm:$0xff]  ;;  %v893_v57 = vpack.c.bf16 %v154_v46, %v153_v45  ;;  %v124_v60 = vld [vmem:[%s1457_s1 + $0x2e8] sm:$0xff]  ;;  %v936_v26 = vmov 0.0|0.0   ;;  %v938_v45 = vmov 0.0  }
  0x29   :  { %433 = vmatprep.mubr.f32.mxu1 %v30_v34  ;;  %v137_v54 = vld [vmem:[%s1457_s1 + $0x350] sm:$0xff]  ;;  %v138_v58 = vld [vmem:[%s1457_s1 + $0x358] sm:$0xff]  ;;  %v155_v61 = vld [vmem:[%s1457_s1 + $0x3e0] sm:$0xff]  ;;  %v863_v0 = vpack.c.bf16 %v106_v53, %v105_v52 }
  0x2a   :  { %848 = vmatpush3.bf16.msra.mxu0 %v847_v2  ;;  %v451_v56 = vadd.f32 %v450_v48, %v444_v39  ;;  %v156_v62 = vld [vmem:[%s1457_s1 + $0x3e8] sm:$0xff]  ;;  %v895_v1 = vpack.c.bf16 %v138_v58, %v137_v54  ;;  %v865_v2 = vpack.c.bf16 %v124_v60, %v123_v59  ;;  %v139_v5 = vld [vmem:[%s1457_s1 + $0x360] sm:$0xff]  ;;  %v125_v9 = vld [vmem:[%s1457_s1 + $0x2f0] sm:$0xff] }
  0x2b   :  { %880 = vmatpush3.bf16.msra.mxu1 %v879_v3  ;;  %850 = vmatprep.subr.bf16.mxu0 %v849_v4  ;;  %v107_v3 = vld [vmem:[%s1457_s1 + $0x260] sm:$0xff]  ;;  %v108_v4 = vld [vmem:[%s1457_s1 + $0x268] sm:$0xff]  ;;  %v897_v7 = vpack.c.bf16 %v156_v62, %v155_v61  ;;  %v126_v10 = vld [vmem:[%s1457_s1 + $0x2f8] sm:$0xff] }
  0x2c   :  { %882 = vmatprep.subr.bf16.mxu1 %v881_v8  ;;  %v452_v63 = vadd.f32 %v451_v56, %v445_v47  ;;  %v140_v8 = vld [vmem:[%s1457_s1 + $0x368] sm:$0xff]  ;;  %v157_v11 = vld [vmem:[%s1457_s1 + $0x3f0] sm:$0xff]  ;;  %v158_v12 = vld [vmem:[%s1457_s1 + $0x3f8] sm:$0xff]  ;;  %v867_v13 = vpack.c.bf16 %v108_v4, %v107_v3  ;;  %v869_v15 = vpack.c.bf16 %v126_v10, %v125_v9 }
  0x2d   :  { %v899_v14 = vpack.c.bf16 %v140_v8, %v139_v5  ;;  %v110_v18 = vld [vmem:[%s1457_s1 + $0x278] sm:$0xff]  ;;  %v485_v24 = vld [vmem:[%s1459_s4 + $0x8] sm:$0xff]  ;;  %v486_v27 = vld [vmem:[%s1459_s4 + $0x10] sm:$0xff] }
  0x2e   :  { %852 = vmatpush3.bf16.msra.mxu0 %v851_v16  ;;  %v453_v6 = vadd.f32 %v452_v63, %v446_v55  ;;  %v109_v16 = vld [vmem:[%s1457_s1 + $0x270] sm:$0xff]  ;;  %v142_v17 = vld [vmem:[%s1457_s1 + $0x378] sm:$0xff]  ;;  %v492_v36 = vld [vmem:[%s1459_s4 + $0x40] sm:$0xff] }
  0x2f   :  { %884 = vmatpush3.bf16.msra.mxu1 %v883_v19  ;;  %854 = vmatprep.subr.bf16.mxu0 %v853_v20  ;;  %v901_v19 = vpack.c.bf16 %v158_v12, %v157_v11  ;;  %v141_v20 = vld [vmem:[%s1457_s1 + $0x370] sm:$0xff]  ;;  %v871_v21 = vpack.c.bf16 %v110_v18, %v109_v16  ;;  %v487_v28 = vld [vmem:[%s1459_s4 + $0x18] sm:$0xff]  ;;  %v493_v37 = vld [vmem:[%s1459_s4 + $0x48] sm:$0xff] }
  0x30   :  { %886 = vmatprep.subr.bf16.mxu1 %v885_v23  ;;  %454 = vadd.xlane.f32.xlu0 %v453_v6  ;;  %v903_v22 = vpack.c.bf16 %v142_v17, %v141_v20  ;;  %v484_v23 = vld [vmem:[%s1459_s4] sm:$0xff]  ;;  %v909_v29 = vpack.c.bf16 %v487_v28, %v486_v27  ;;  %v491_v34 = vld [vmem:[%s1459_s4 + $0x38] sm:$0xff]  ;;  %v918_v38 = vpack.c.bf16 %v493_v37, %v492_v36  ;;  %v494_v39 = vld [vmem:[%s1459_s4 + $0x50] sm:$0xff] }
  0x31   :  { %v906_v25 = vpack.c.bf16 %v485_v24, %v484_v23  ;;  %v495_v40 = vld [vmem:[%s1459_s4 + $0x58] sm:$0xff]  ;;  %v496_v42 = vld [vmem:[%s1459_s4 + $0x60] sm:$0xff]  ;;  %v497_v43 = vld [vmem:[%s1459_s4 + $0x68] sm:$0xff] }
  0x32   :  { %856 = vmatpush3.bf16.msra.mxu0 %v855_v30  ;;  %v488_v30 = vld [vmem:[%s1459_s4 + $0x20] sm:$0xff]  ;;  %v498_v46 = vld [vmem:[%s1459_s4 + $0x70] sm:$0xff]  ;;  %v499_v47 = vld [vmem:[%s1459_s4 + $0x78] sm:$0xff] }
  0x33   :  { %888 = vmatpush3.bf16.msra.mxu1 %v887_v31  ;;  %858 = vmatprep.subr.bf16.mxu0 %v857_v35  ;;  %v489_v31 = vld [vmem:[%s1459_s4 + $0x28] sm:$0xff]  ;;  %v927_v48 = vpack.c.bf16 %v499_v47, %v498_v46  ;;  %v582_v63 = vld [vmem:[%s1460_s2] ss:$0 sm:$0xff] }
  0x34   :  { %890 = vmatprep.subr.bf16.mxu1 %v889_v41  ;;  %v912_v32 = vpack.c.bf16 %v489_v31, %v488_v30  ;;  %v921_v41 = vpack.c.bf16 %v495_v40, %v494_v39  ;;  %v583_v9 = vld [vmem:[%s1461_s3] ss:$0 sm:$0xff] }
  0x36   :  { %860 = vmatpush3.bf16.msra.mxu0 %v859_v49 }
  0x37   :  { %892 = vmatpush3.bf16.msra.mxu1 %v891_v50  ;;  %862 = vmatprep.subr.bf16.mxu0 %v861_v51 }
  0x38   :  { %894 = vmatprep.subr.bf16.mxu1 %v893_v57 }
  0x3a   :  { %864 = vmatpush3.bf16.msra.mxu0 %v863_v0 }
  0x3b   :  { %896 = vmatpush3.bf16.msra.mxu1 %v895_v1  ;;  %866 = vmatprep.subr.bf16.mxu0 %v865_v2 }
  0x3c   :  { %898 = vmatprep.subr.bf16.mxu1 %v897_v7 }
  0x3e   :  { %868 = vmatpush3.bf16.msra.mxu0 %v867_v13 }
  0x3f   :  { %900 = vmatpush3.bf16.msra.mxu1 %v899_v14  ;;  %870 = vmatprep.subr.bf16.mxu0 %v869_v15  ;;  %v584_v15 = vld [vmem:[%s1462_s5] ss:$0 sm:$0xff] }
  0x40   :  { %902 = vmatprep.subr.bf16.mxu1 %v901_v19 }
  0x42   :  { %872 = vmatpush3.bf16.msra.mxu0 %v871_v21 }
  0x43   :  { %904 = vmatpush3.bf16.msra.mxu1 %v903_v22  ;;  %905 = vmatprep.subr.bf16.mxu0 %v936_v26 }
  0x45   :  { %364 = vmatmul.mubr.f32.vlgmr.msra.gmra.mrb[2].mxu0 %v1300_v33  ;;  %v490_v33 = vld [vmem:[%s1459_s4 + $0x30] sm:$0xff] }
  0x46   :  { %434 = vmatmul.mubr.f32.vlgmr.msra.gmra.mrb[2].mxu1 %v1325_v44  ;;  %907 = vmatpush3.bf16.msra.mxu0 %v906_v25  ;;  %v915_v35 = vpack.c.bf16 %v491_v34, %v490_v33  ;;  %v924_v44 = vpack.c.bf16 %v497_v43, %v496_v42 }
  0x47   :  { %908 = vmatprep.subr.bf16.mxu0 %v936_v26  ;;  %774 = vmatprep.mubr.msk.f32.mxu0 %vm937_vm0, %v938_v45 }
  0x4a   :  { %910 = vmatpush3.bf16.msra.mxu0 %v909_v29 }
  0x4b   :  { %911 = vmatprep.subr.bf16.mxu0 %v936_v26 }
  0x4e   :  { %913 = vmatpush3.bf16.msra.mxu0 %v912_v32 }
  0x4f   :  { %914 = vmatprep.subr.bf16.mxu0 %v936_v26 }
  0x52   :  { %916 = vmatpush3.bf16.msra.mxu0 %v915_v35 }
  0x53   :  { %917 = vmatprep.subr.bf16.mxu0 %v936_v26 }
  0x56   :  { %919 = vmatpush3.bf16.msra.mxu0 %v918_v38 }
  0x57   :  { %920 = vmatprep.subr.bf16.mxu0 %v936_v26 }
  0x5a   :  { %922 = vmatpush3.bf16.msra.mxu0 %v921_v41 }
  0x5b   :  { %923 = vmatprep.subr.bf16.mxu0 %v936_v26 }
  0x5e   :  { %925 = vmatpush3.bf16.msra.mxu0 %v924_v44 }
  0x5f   :  { %926 = vmatprep.subr.bf16.mxu0 %v936_v26 }
  0x62   :  { %928 = vmatpush3.bf16.msra.mxu0 %v927_v48 }
  0xbd   :  { %v455_v62 = vpop.xlane.xlu0 %454 }
  0xbe   :  { %v463_v2 = vadd.f32 %v582_v63, %v455_v62 }
  0xf8   :  { %v617_v49 = vpop.f32.mrb[0].mxu0 }
  0xf9   :  { %v652_v50 = vpop.f32.mrb[0].mxu1  ;;  %v618_v51 = vpop.f32.mrb[1].mxu0 }
  0xfa   :  { %v619_v52 = vadd.f32 %v618_v51, %v617_v49  ;;  %v653_v53 = vpop.f32.mrb[1].mxu1 }
  0xfb   :  { %v654_v54 = vadd.f32 %v653_v53, %v652_v50 }
  0xfd   :  { %v296_v55 = vadd.f32 %v654_v54, %v619_v52 }
 0x118   :  { %v687_v56 = vpop.f32.mrb[2].mxu0 }
 0x119   :  { %v688_v57 = vpop.f32.mrb[3].mxu0  ;;  %v722_v58 = vpop.f32.mrb[2].mxu1 }
 0x11a   :  { %v689_v59 = vadd.f32 %v688_v57, %v687_v56  ;;  %v723_v60 = vpop.f32.mrb[3].mxu1 }
 0x11b   :  { %v724_v61 = vadd.f32 %v723_v60, %v722_v58 }
 0x11c   :  { %v366_v0 = vadd.f32 %v689_v59, %v296_v55 }
 0x11e   :  { %v436_v1 = vadd.f32 %v724_v61, %v366_v0 }
 0x120   :  { %v464_v3 = vmul.f32 2.0, %v436_v1 }
 0x122   :  { %v465_v4 = vsub.f32 %v463_v2, %v464_v3 }
 0x124   :  { %v466_v5 = vmax.f32 %v465_v4, 0.0 }
 0x126   :  { %932 = vrsqrt.f32 %v466_v5  ;;  %vm469_vm1 = vcmp.eq.f32.partialorder %v466_v5, inf  ;;  %v472_v8 = vand.u32 2147483648, %v466_v5  ;;  %vm471_vm2 = vcmp.eq.f32.partialorder %v466_v5, 0.0 }
 0x130   :  { %v933_v6 = vpop.eup %932 }
 0x131   :  { %v468_v7 = vmul.f32 %v933_v6, %v466_v5 }
 0x133   :  { %v470_v10 = vsel %vm469_vm1, %v466_v5, %v468_v7 }
 0x134   :  { %v473_v11 = vsel %vm471_vm2, %v472_v8, %v470_v10 }
 0x135   :  { %v481_v12 = vmul.f32 %v583_v9, %v473_v11 }
 0x137   :  { %v482_v13 = vmul.f32 1.442695, %v481_v12 }
 0x139   :  { %934 = vpow2.f32 %v482_v13 }
 0x143   :  { %v935_v14 = vpop.eup %934 }
 0x144   :  { %775 = vmatmul.mubr.f32.vlgmr.msra.gmra.mrb[4].mxu0 %v935_v14 }
 0x217   :  { %v573_v16 = vpop.f32.mrb[4].mxu0 }
 0x218   :  { %v574_v18 = vadd.f32 %v584_v15, %v573_v16  ;;  %v776_v19 = vpop.f32.mrb[5].mxu0 }
 0x21a   :  { %577 = vst [vmem:[%s1463_s6] sm:$0xff] %v574_v18 }

</bundles_post_ra>
